<compile_context>
chip_gen: v7x
topology: tpu7x:2x2x1
jax: 0.10.0
libtpu: 0.0.40
codegen_flags: <defaults>
</compile_context>

<pallas_src>
import functools
import math

import jax
import jax.numpy as jnp
from jax.experimental import pallas as pl
from jax.experimental.pallas import tpu as pltpu


def _round_up(v, m):
    return ((v + m - 1) // m) * m


# ---------------------------------------------------------------------------
# Pass 1: hw = s_i * ( relu(LayerNorm(s_i * ((A+I) @ x_s) @ W1^T + b1)) @ W2^T )
#         with x_s = diag(s) x pre-scaled in the wrapper.
# ---------------------------------------------------------------------------
def _pass1_kernel(a_ref, x_ref, s_ref, w1t_ref, b1_ref, g_ref, bt_ref, w2t_ref,
                  hw_ref, acc_ref, *, true_h, tk, x_resident):
    k = pl.program_id(1)

    @pl.when(k == 0)
    def _():
        acc_ref[...] = jnp.zeros_like(acc_ref)

    # Integer adjacency counts streamed as int8; exact when widened to bf16.
    a = a_ref[...].astype(jnp.float32).astype(jnp.bfloat16)
    if x_resident:
        start = pl.multiple_of(k * tk, tk)
        xk = x_ref[pl.ds(start, tk), :]
    else:
        xk = x_ref[...]
    acc_ref[...] += jnp.dot(a, xk, preferred_element_type=jnp.float32)

    @pl.when(k == pl.num_programs(1) - 1)
    def _():
        # Row scaling s_i completes A_norm = diag(s)(A+I)diag(s) (x was pre-scaled by s_j).
        ax = acc_ref[...] * s_ref[...]                              # [TM, CinP] f32
        z = jnp.dot(ax.astype(jnp.bfloat16), w1t_ref[...],
                    preferred_element_type=jnp.float32) + b1_ref[...]   # [TM, HP]

        # LayerNorm over the TRUE feature width; padded lanes masked out.
        lane = jax.lax.broadcasted_iota(jnp.int32, z.shape, 1)
        mask = (lane < true_h).astype(jnp.float32)
        inv_h = 1.0 / float(true_h)
        mean = jnp.sum(z * mask, axis=-1, keepdims=True) * inv_h
        diff = (z - mean) * mask
        var = jnp.sum(diff * diff, axis=-1, keepdims=True) * inv_h
        h = diff * jax.lax.rsqrt(var + 1e-5) * g_ref[...] + bt_ref[...]

        h = jnp.maximum(h, 0.0)                                     # ReLU
        # Dropout(p=0.1) is identity in eval mode.
        # TODO(synk): training-mode dropout via pltpu.prng_seed/prng_random_bits.

        hw = jnp.dot(h.astype(jnp.bfloat16), w2t_ref[...],
                     preferred_element_type=jnp.float32)            # [TM, OP]
        # Pre-scale rows by s_i so pass 2 only needs the integer adjacency again.
        hw_ref[...] = (hw * s_ref[...]).astype(hw_ref.dtype)


# ---------------------------------------------------------------------------
# Pass 2: out = s_i * ((A+I) @ hw) + b2   (hw already carries the s_j row scale)
# ---------------------------------------------------------------------------
def _pass2_kernel(a_ref, hw_ref, s_ref, b2_ref, o_ref, acc_ref, *, tk, hw_resident):
    k = pl.program_id(1)

    @pl.when(k == 0)
    def _():
        acc_ref[...] = jnp.zeros_like(acc_ref)

    a = a_ref[...].astype(jnp.float32).astype(jnp.bfloat16)
    if hw_resident:
        start = pl.multiple_of(k * tk, tk)
        hk = hw_ref[pl.ds(start, tk), :]
    else:
        hk = hw_ref[...]
    acc_ref[...] += jnp.dot(a, hk, preferred_element_type=jnp.float32)

    @pl.when(k == pl.num_programs(1) - 1)
    def _():
        o_ref[...] = acc_ref[...] * s_ref[...] + b2_ref[...]


# ---------------------------------------------------------------------------
# Wrapper
# ---------------------------------------------------------------------------
def graph_encoder_forward(x, a_int, s, w1, b1, gamma, beta, w2, b2,
                          *, tm=1024, tk=1024, resident_limit_rows=16384):
    """
    x:      [N, Cin]   node features
    a_int:  [N, N]     integer adjacency counts with self loops (exact small ints)
    s:      [N]        D^{-1/2} scaling so A_norm = diag(s) @ a_int @ diag(s)
    w1:     [H, Cin]   GCNConv-1 linear weight (PyG layout: [out, in]);  b1: [H]
    gamma, beta: [H]   LayerNorm affine params
    w2:     [O, H]     GCNConv-2 linear weight;  b2: [O]
    returns [N, O] float32
    """
    n, cin = x.shape
    h_dim = w1.shape[0]
    o_dim = w2.shape[0]

    cin_p = _round_up(cin, 128)
    h_p = _round_up(h_dim, 128)
    o_p = _round_up(o_dim, 128)

    # Tile sizes clamped to the graph size; pad N only to what the tiles need.
    n_lane = _round_up(n, 128)
    tk_eff = min(tk, n_lane)
    tm_eff = min(tm, n_lane)
    n_p = _round_up(n, math.lcm(tm_eff, tk_eff))
    if n_p // tm_eff < 2:
        tm_eff = max(n_p // 2, 8)      # >=2 row tiles so v7x megacore can split rows
    grid = (n_p // tm_eff, n_p // tk_eff)
    resident = n_p <= resident_limit_rows   # keep x / hw fully resident in VMEM

    # A streamed as exact int8 counts; x pre-scaled by s and streamed in bf16.
    a_p = jnp.zeros((n_p, n_p), jnp.int8).at[:n, :n].set(
        jnp.asarray(a_int, jnp.float32).astype(jnp.int8))
    s_f32 = jnp.asarray(s, jnp.float32)
    x_sc = jnp.asarray(x, jnp.float32) * s_f32[:, None]
    x_p = jnp.zeros((n_p, cin_p), jnp.bfloat16).at[:n, :cin].set(
        x_sc.astype(jnp.bfloat16))
    s_p = jnp.zeros((n_p, 1), jnp.float32).at[:n, 0].set(s_f32)   # 0 on padded rows

    w1t = jnp.zeros((cin_p, h_p), jnp.bfloat16).at[:cin, :h_dim].set(
        jnp.asarray(w1, jnp.float32).T.astype(jnp.bfloat16))
    w2t = jnp.zeros((h_p, o_p), jnp.bfloat16).at[:h_dim, :o_dim].set(
        jnp.asarray(w2, jnp.float32).T.astype(jnp.bfloat16))
    b1r = jnp.zeros((1, h_p), jnp.float32).at[0, :h_dim].set(jnp.asarray(b1, jnp.float32))
    gr = jnp.zeros((1, h_p), jnp.float32).at[0, :h_dim].set(jnp.asarray(gamma, jnp.float32))
    br = jnp.zeros((1, h_p), jnp.float32).at[0, :h_dim].set(jnp.asarray(beta, jnp.float32))
    b2r = jnp.zeros((1, o_p), jnp.float32).at[0, :o_dim].set(jnp.asarray(b2, jnp.float32))

    cparams = pltpu.CompilerParams(
        dimension_semantics=("parallel", "arbitrary"),
        vmem_limit_bytes=32 * 1024 * 1024)

    if resident:
        x_spec = pl.BlockSpec((n_p, cin_p), lambda i, k: (0, 0))    # DMA'd once
        hw_spec = pl.BlockSpec((n_p, o_p), lambda i, k: (0, 0))
    else:
        x_spec = pl.BlockSpec((tk_eff, cin_p), lambda i, k: (k, 0))
        hw_spec = pl.BlockSpec((tk_eff, o_p), lambda i, k: (k, 0))

    # ---- Pass 1 ----
    hw = pl.pallas_call(
        functools.partial(_pass1_kernel, true_h=h_dim, tk=tk_eff, x_resident=resident),
        out_shape=jax.ShapeDtypeStruct((n_p, o_p), jnp.bfloat16),
        grid=grid,
        in_specs=[
            pl.BlockSpec((tm_eff, tk_eff), lambda i, k: (i, k)),    # A (int8)
            x_spec,                                                 # x (bf16)
            pl.BlockSpec((tm_eff, 1), lambda i, k: (i, 0)),         # s rows
            pl.BlockSpec((cin_p, h_p), lambda i, k: (0, 0)),        # W1^T (bf16)
            pl.BlockSpec((1, h_p), lambda i, k: (0, 0)),            # b1
            pl.BlockSpec((1, h_p), lambda i, k: (0, 0)),            # gamma
            pl.BlockSpec((1, h_p), lambda i, k: (0, 0)),            # beta
            pl.BlockSpec((h_p, o_p), lambda i, k: (0, 0)),          # W2^T (bf16)
        ],
        out_specs=pl.BlockSpec((tm_eff, o_p), lambda i, k: (i, 0)),
        scratch_shapes=[pltpu.VMEM((tm_eff, cin_p), jnp.float32)],
        compiler_params=cparams,
    )(a_p, x_p, s_p, w1t, b1r, gr, br, w2t)

    # ---- Pass 2 ----
    out_p = pl.pallas_call(
        functools.partial(_pass2_kernel, tk=tk_eff, hw_resident=resident),
        out_shape=jax.ShapeDtypeStruct((n_p, o_p), jnp.float32),
        grid=grid,
        in_specs=[
            pl.BlockSpec((tm_eff, tk_eff), lambda i, k: (i, k)),    # A (int8)
            hw_spec,                                                # hw (bf16)
            pl.BlockSpec((tm_eff, 1), lambda i, k: (i, 0)),         # s rows
            pl.BlockSpec((1, o_p), lambda i, k: (0, 0)),            # b2
        ],
        out_specs=pl.BlockSpec((tm_eff, o_p), lambda i, k: (i, 0)),
        scratch_shapes=[pltpu.VMEM((tm_eff, o_p), jnp.float32)],
        compiler_params=cparams,
    )(a_p, hw, s_p, b2r)

    return out_p[:n, :o_dim]


# ---------------------------------------------------------------------------
# Glue: factored GCN normalization from a sparse edge list.
#   A_norm = diag(s) @ (A + I) @ diag(s),  s = D^{-1/2}.
# Returns the EXACT integer counts (as f32) plus the scaling vector, so the
# kernel can stream the adjacency as int8.
# TODO(synk): for large sparse graphs, replace dense streaming with a blocked-CSR
# PrefetchScalarGridSpec that skips all-zero adjacency tiles.
# ---------------------------------------------------------------------------
def build_gcn_adjacency_factored(edge_index, num_nodes):
    src, dst = edge_index
    a = jnp.zeros((num_nodes, num_nodes), jnp.float32)
    a = a.at[dst, src].add(1.0)                       # sum duplicate edges (scatter-add)
    diag = jnp.diagonal(a)
    a = a + jnp.diag(jnp.where(diag == 0, 1.0, 0.0))  # add remaining self loops
    deg = jnp.sum(a, axis=1)
    s = jnp.where(deg > 0, jax.lax.rsqrt(deg), 0.0)
    return a, s                                       # a holds exact small integer counts


def reference_forward(x, a_norm, w1, b1, gamma, beta, w2, b2):
    """Pure-JAX f32 reference matching the PyTorch forward (eval mode)."""
    h = a_norm @ (x @ w1.T) + b1
    mean = jnp.mean(h, axis=-1, keepdims=True)
    var = jnp.mean((h - mean) ** 2, axis=-1, keepdims=True)
    h = (h - mean) / jnp.sqrt(var + 1e-5) * gamma + beta
    h = jnp.maximum(h, 0.0)
    return a_norm @ (h @ w2.T) + b2


if __name__ == "__main__":
    # Small shapes consistent with the module: N nodes, in=16, hidden=32, out=8.
    N, C_IN, C_HID, C_OUT = 64, 16, 32, 8
    NUM_EDGES = 256

    key = jax.random.PRNGKey(0)
    k_x, k_e, k_w1, k_b1, k_w2, k_b2 = jax.random.split(key, 6)

    x = jax.random.normal(k_x, (N, C_IN), jnp.float32)

    # Random sparse graph (stand-in for the SparseTensor edge_index).
    edges = jax.random.randint(k_e, (2, NUM_EDGES), 0, N)
    a_int, s_vec = build_gcn_adjacency_factored((edges[0], edges[1]), N)
    # int8 adjacency streaming requires edge multiplicities <= 127.
    # TODO(synk): fall back to a bf16 adjacency stream for heavier multigraphs.
    assert int(jnp.max(a_int)) <= 127

    # Deterministic parameter init (Glorot-ish scaling).
    w1 = jax.random.normal(k_w1, (C_HID, C_IN), jnp.float32) * (1.0 / jnp.sqrt(C_IN))
    b1 = jax.random.normal(k_b1, (C_HID,), jnp.float32) * 0.01
    gamma = jnp.ones((C_HID,), jnp.float32)
    beta = jnp.zeros((C_HID,), jnp.float32)
    w2 = jax.random.normal(k_w2, (C_OUT, C_HID), jnp.float32) * (1.0 / jnp.sqrt(C_HID))
    b2 = jax.random.normal(k_b2, (C_OUT,), jnp.float32) * 0.01

    out = graph_encoder_forward(x, a_int, s_vec, w1, b1, gamma, beta, w2, b2)
    out = jax.block_until_ready(out)
    assert out.shape == (N, C_OUT)

    a_norm = s_vec[:, None] * a_int * s_vec[None, :]
    ref = reference_forward(x, a_norm, w1, b1, gamma, beta, w2, b2)
    # x / hw / epilogue operands are bf16 -> compare with a scaled tolerance.
    err = jnp.max(jnp.abs(out - ref)) / (jnp.max(jnp.abs(ref)) + 1e-6)
    assert err < 4e-2, f"kernel/reference mismatch: scaled max err {err}"

    print("KERNEL_OK")
</pallas_src>

<mosaic_0001>
module attributes {stable_mosaic.version = 11 : i64} {
  func.func @_pass1_kernel(%arg0: i32, %arg1: i32, %arg2: memref<64x128xi8, #tpu.memory_space<vmem>>, %arg3: memref<128x128xbf16, #tpu.memory_space<vmem>>, %arg4: memref<64x1xf32, #tpu.memory_space<vmem>>, %arg5: memref<128x128xbf16, #tpu.memory_space<vmem>>, %arg6: memref<1x128xf32, #tpu.memory_space<vmem>>, %arg7: memref<1x128xf32, #tpu.memory_space<vmem>>, %arg8: memref<1x128xf32, #tpu.memory_space<vmem>>, %arg9: memref<128x128xbf16, #tpu.memory_space<vmem>>, %arg10: memref<64x128xbf16, #tpu.memory_space<vmem>>, %arg11: memref<64x128xf32, #tpu.memory_space<vmem>>) attributes {dimension_semantics = [#tpu.dimension_semantics<parallel>, #tpu.dimension_semantics<arbitrary>], iteration_bounds = array<i64: 2, 1>, scalar_prefetch = 0 : i64, scratch_operands = 1 : i64, tpu.core_type = #tpu.core_type<tc>, window_params = [{transform_indices = @transform_0, window_bounds = array<i64: 64, 128>}, {pipeline_mode = #tpu.pipeline_mode<synchronous>, transform_indices = @transform_1, window_bounds = array<i64: 128, 128>}, {transform_indices = @transform_2, window_bounds = array<i64: 64, 1>}, {pipeline_mode = #tpu.pipeline_mode<synchronous>, transform_indices = @transform_3, window_bounds = array<i64: 128, 128>}, {pipeline_mode = #tpu.pipeline_mode<synchronous>, transform_indices = @transform_4, window_bounds = array<i64: 1, 128>}, {pipeline_mode = #tpu.pipeline_mode<synchronous>, transform_indices = @transform_5, window_bounds = array<i64: 1, 128>}, {pipeline_mode = #tpu.pipeline_mode<synchronous>, transform_indices = @transform_6, window_bounds = array<i64: 1, 128>}, {pipeline_mode = #tpu.pipeline_mode<synchronous>, transform_indices = @transform_7, window_bounds = array<i64: 128, 128>}, {transform_indices = @transform_8, window_bounds = array<i64: 64, 128>}]} {
    %c0_i32 = arith.constant 0 : i32
    %0 = arith.cmpi eq, %arg1, %c0_i32 : i32
    %1 = arith.extui %0 : i1 to i32
    %c0_i32_0 = arith.constant 0 : i32
    %2 = arith.cmpi ne, %1, %c0_i32_0 : i32
    scf.if %2 {
      %cst_9 = arith.constant 0.000000e+00 : f32
      %17 = vector.broadcast %cst_9 : f32 to vector<64x128xf32>
      %c0_10 = arith.constant 0 : index
      %c0_11 = arith.constant 0 : index
      %18 = vector.load %arg11[%c0_10, %c0_11] : memref<64x128xf32, #tpu.memory_space<vmem>>, vector<64x128xf32>
      tpu.vector_store %arg11[%c0_10, %c0_11], %17 {strides = array<i32>} : memref<64x128xf32, #tpu.memory_space<vmem>>, vector<64x128xf32>,
    } else {
    }
    %c0 = arith.constant 0 : index
    %c0_1 = arith.constant 0 : index
    %3 = vector.load %arg2[%c0, %c0_1] : memref<64x128xi8, #tpu.memory_space<vmem>>, vector<64x128xi8>
    %4 = arith.sitofp %3 : vector<64x128xi8> to vector<64x128xf32>
    %5 = arith.truncf %4 : vector<64x128xf32> to vector<64x128xbf16>
    %c128_i32 = arith.constant 128 : i32
    %6 = arith.muli %arg1, %c128_i32 : i32
    %7 = tpu.assume_multiple %6, 128 : i32
    %8 = arith.index_cast %7 : i32 to index
    %c0_2 = arith.constant 0 : index
    %9 = vector.load %arg3[%8, %c0_2] : memref<128x128xbf16, #tpu.memory_space<vmem>>, vector<128x128xbf16>
    %c0_3 = arith.constant 0 : index
    %c0_4 = arith.constant 0 : index
    %10 = vector.load %arg11[%c0_3, %c0_4] : memref<64x128xf32, #tpu.memory_space<vmem>>, vector<64x128xf32>
    %cst = arith.constant dense<0.000000e+00> : vector<64x128xf32>
    %11 = tpu.matmul %5, %9, %cst {dimension_numbers = #tpu.dot_dimension_numbers<[1], [0], [0], [1], [0, 0, 1, 1], [], []>} : vector<64x128xbf16>, vector<128x128xbf16>, vector<64x128xf32> -> vector<64x128xf32>
    %12 = arith.addf %10, %11 : vector<64x128xf32>
    %c0_5 = arith.constant 0 : index
    %c0_6 = arith.constant 0 : index
    %13 = vector.load %arg11[%c0_5, %c0_6] : memref<64x128xf32, #tpu.memory_space<vmem>>, vector<64x128xf32>
    tpu.vector_store %arg11[%c0_5, %c0_6], %12 {strides = array<i32>} : memref<64x128xf32, #tpu.memory_space<vmem>>, vector<64x128xf32>,
    %c0_i32_7 = arith.constant 0 : i32
    %14 = arith.cmpi eq, %arg1, %c0_i32_7 : i32
    %15 = arith.extui %14 : i1 to i32
    %c0_i32_8 = arith.constant 0 : i32
    %16 = arith.cmpi ne, %15, %c0_i32_8 : i32
    scf.if %16 {
      %c0_9 = arith.constant 0 : index
      %c0_10 = arith.constant 0 : index
      %17 = vector.load %arg11[%c0_9, %c0_10] : memref<64x128xf32, #tpu.memory_space<vmem>>, vector<64x128xf32>
      %c0_11 = arith.constant 0 : index
      %c0_12 = arith.constant 0 : index
      %18 = vector.load %arg4[%c0_11, %c0_12] : memref<64x1xf32, #tpu.memory_space<vmem>>, vector<64x1xf32>
      %19 = vector.broadcast %18 : vector<64x1xf32> to vector<64x128xf32>
      %20 = arith.mulf %17, %19 : vector<64x128xf32>
      %21 = arith.truncf %20 : vector<64x128xf32> to vector<64x128xbf16>
      %c0_13 = arith.constant 0 : index
      %c0_14 = arith.constant 0 : index
      %22 = vector.load %arg5[%c0_13, %c0_14] : memref<128x128xbf16, #tpu.memory_space<vmem>>, vector<128x128xbf16>
      %cst_15 = arith.constant dense<0.000000e+00> : vector<64x128xf32>
      %23 = tpu.matmul %21, %22, %cst_15 {dimension_numbers = #tpu.dot_dimension_numbers<[1], [0], [0], [1], [0, 0, 1, 1], [], []>} : vector<64x128xbf16>, vector<128x128xbf16>, vector<64x128xf32> -> vector<64x128xf32>
      %c0_16 = arith.constant 0 : index
      %c0_17 = arith.constant 0 : index
      %24 = vector.load %arg6[%c0_16, %c0_17] : memref<1x128xf32, #tpu.memory_space<vmem>>, vector<1x128xf32>
      %25 = vector.broadcast %24 : vector<1x128xf32> to vector<64x128xf32>
      %26 = arith.addf %23, %25 : vector<64x128xf32>
      %27 = tpu.iota {dimensions = array<i32: 1>} : vector<64x128xi32>
      %c32_i32 = arith.constant 32 : i32
      %28 = vector.broadcast %c32_i32 : i32 to vector<64x128xi32>
      %29 = arith.cmpi slt, %27, %28 : vector<64x128xi32>
      %30 = arith.extui %29 : vector<64x128xi1> to vector<64x128xi32>
      %31 = arith.sitofp %30 : vector<64x128xi32> to vector<64x128xf32>
      %32 = arith.mulf %26, %31 : vector<64x128xf32>
      %cst_18 = arith.constant dense<0.000000e+00> : vector<64xf32>
      %33 = vector.multi_reduction <add>, %32, %cst_18 [1] : vector<64x128xf32> to vector<64xf32>
      %34 = vector.shape_cast %33 : vector<64xf32> to vector<64x1xf32>
      %cst_19 = arith.constant 3.125000e-02 : f32
      %35 = vector.broadcast %cst_19 : f32 to vector<64x1xf32>
      %36 = arith.mulf %34, %35 : vector<64x1xf32>
      %37 = vector.broadcast %36 : vector<64x1xf32> to vector<64x128xf32>
      %38 = arith.subf %26, %37 : vector<64x128xf32>
      %39 = arith.mulf %38, %31 : vector<64x128xf32>
      %40 = arith.mulf %39, %39 : vector<64x128xf32>
      %cst_20 = arith.constant dense<0.000000e+00> : vector<64xf32>
      %41 = vector.multi_reduction <add>, %40, %cst_20 [1] : vector<64x128xf32> to vector<64xf32>
      %42 = vector.shape_cast %41 : vector<64xf32> to vector<64x1xf32>
      %cst_21 = arith.constant 3.125000e-02 : f32
      %43 = vector.broadcast %cst_21 : f32 to vector<64x1xf32>
      %44 = arith.mulf %42, %43 : vector<64x1xf32>
      %cst_22 = arith.constant 9.99999974E-6 : f32
      %45 = vector.broadcast %cst_22 : f32 to vector<64x1xf32>
      %46 = arith.addf %44, %45 : vector<64x1xf32>
      %47 = math.rsqrt %46 : vector<64x1xf32>
      %48 = vector.broadcast %47 : vector<64x1xf32> to vector<64x128xf32>
      %49 = arith.mulf %39, %48 : vector<64x128xf32>
      %c0_23 = arith.constant 0 : index
      %c0_24 = arith.constant 0 : index
      %50 = vector.load %arg7[%c0_23, %c0_24] : memref<1x128xf32, #tpu.memory_space<vmem>>, vector<1x128xf32>
      %51 = vector.broadcast %50 : vector<1x128xf32> to vector<64x128xf32>
      %52 = arith.mulf %49, %51 : vector<64x128xf32>
      %c0_25 = arith.constant 0 : index
      %c0_26 = arith.constant 0 : index
      %53 = vector.load %arg8[%c0_25, %c0_26] : memref<1x128xf32, #tpu.memory_space<vmem>>, vector<1x128xf32>
      %54 = vector.broadcast %53 : vector<1x128xf32> to vector<64x128xf32>
      %55 = arith.addf %52, %54 : vector<64x128xf32>
      %cst_27 = arith.constant 0.000000e+00 : f32
      %56 = vector.broadcast %cst_27 : f32 to vector<64x128xf32>
      %57 = arith.maximumf %55, %56 : vector<64x128xf32>
      %58 = arith.truncf %57 : vector<64x128xf32> to vector<64x128xbf16>
      %c0_28 = arith.constant 0 : index
      %c0_29 = arith.constant 0 : index
      %59 = vector.load %arg9[%c0_28, %c0_29] : memref<128x128xbf16, #tpu.memory_space<vmem>>, vector<128x128xbf16>
      %cst_30 = arith.constant dense<0.000000e+00> : vector<64x128xf32>
      %60 = tpu.matmul %58, %59, %cst_30 {dimension_numbers = #tpu.dot_dimension_numbers<[1], [0], [0], [1], [0, 0, 1, 1], [], []>} : vector<64x128xbf16>, vector<128x128xbf16>, vector<64x128xf32> -> vector<64x128xf32>
      %c0_31 = arith.constant 0 : index
      %c0_32 = arith.constant 0 : index
      %61 = vector.load %arg4[%c0_31, %c0_32] : memref<64x1xf32, #tpu.memory_space<vmem>>, vector<64x1xf32>
      %62 = vector.broadcast %61 : vector<64x1xf32> to vector<64x128xf32>
      %63 = arith.mulf %60, %62 : vector<64x128xf32>
      %64 = arith.truncf %63 : vector<64x128xf32> to vector<64x128xbf16>
      %c0_33 = arith.constant 0 : index
      %c0_34 = arith.constant 0 : index
      %65 = vector.load %arg10[%c0_33, %c0_34] : memref<64x128xbf16, #tpu.memory_space<vmem>>, vector<64x128xbf16>
      tpu.vector_store %arg10[%c0_33, %c0_34], %64 {strides = array<i32>} : memref<64x128xbf16, #tpu.memory_space<vmem>>, vector<64x128xbf16>,
    } else {
    }
    return
  }
  func.func @transform_0(%arg0: i32, %arg1: i32) -> (i32, i32) {
    %c0_i32 = arith.constant 0 : i32
    return %arg0, %arg1 : i32, i32
  }
  func.func @transform_1(%arg0: i32, %arg1: i32) -> (i32, i32) {
    %c0_i32 = arith.constant 0 : i32
    %c0_i32_0 = arith.constant 0 : i32
    %c0_i32_1 = arith.constant 0 : i32
    return %c0_i32, %c0_i32_0 : i32, i32
  }
  func.func @transform_2(%arg0: i32, %arg1: i32) -> (i32, i32) {
    %c0_i32 = arith.constant 0 : i32
    %c0_i32_0 = arith.constant 0 : i32
    return %arg0, %c0_i32 : i32, i32
  }
  func.func @transform_3(%arg0: i32, %arg1: i32) -> (i32, i32) {
    %c0_i32 = arith.constant 0 : i32
    %c0_i32_0 = arith.constant 0 : i32
    %c0_i32_1 = arith.constant 0 : i32
    return %c0_i32, %c0_i32_0 : i32, i32
  }
  func.func @transform_4(%arg0: i32, %arg1: i32) -> (i32, i32) {
    %c0_i32 = arith.constant 0 : i32
    %c0_i32_0 = arith.constant 0 : i32
    %c0_i32_1 = arith.constant 0 : i32
    return %c0_i32, %c0_i32_0 : i32, i32
  }
  func.func @transform_5(%arg0: i32, %arg1: i32) -> (i32, i32) {
    %c0_i32 = arith.constant 0 : i32
    %c0_i32_0 = arith.constant 0 : i32
    %c0_i32_1 = arith.constant 0 : i32
    return %c0_i32, %c0_i32_0 : i32, i32
  }
  func.func @transform_6(%arg0: i32, %arg1: i32) -> (i32, i32) {
    %c0_i32 = arith.constant 0 : i32
    %c0_i32_0 = arith.constant 0 : i32
    %c0_i32_1 = arith.constant 0 : i32
    return %c0_i32, %c0_i32_0 : i32, i32
  }
  func.func @transform_7(%arg0: i32, %arg1: i32) -> (i32, i32) {
    %c0_i32 = arith.constant 0 : i32
    %c0_i32_0 = arith.constant 0 : i32
    %c0_i32_1 = arith.constant 0 : i32
    return %c0_i32, %c0_i32_0 : i32, i32
  }
  func.func @transform_8(%arg0: i32, %arg1: i32) -> (i32, i32) {
    %c0_i32 = arith.constant 0 : i32
    %c0_i32_0 = arith.constant 0 : i32
    return %arg0, %c0_i32 : i32, i32
  }
}

</mosaic_0001>

<bundles_post_ra>
// kernel: tpu_custom_call.1
= control target key start
LH: loop header
LB: loop body
LE: loop exit
PB: predicated region body
PF: predicated region fallthrough
CT: control target
= control target key end

     0   :  { %s2133_s0 = inlined_call_operand.hbm [shape: s8[128,128], index: 0, kind: input, shape index: {}]   ;;  %s2134_s1 = inlined_call_operand.vmem [shape: bf16[128,128], index: 1, kind: input, shape index: {}]   ;;  %s2135_s2 = inlined_call_operand.vmem [shape: f32[128,1], index: 2, kind: input, shape index: {}]   ;;  %s2136_s3 = inlined_call_operand.vmem [shape: bf16[128,128], index: 3, kind: input, shape index: {}]   ;;  %s2137_s4 = inlined_call_operand.vmem [shape: f32[1,128], index: 4, kind: input, shape index: {}]   ;;  %s2138_s5 = inlined_call_operand.vmem [shape: f32[1,128], index: 5, kind: input, shape index: {}]   ;;  %s2139_s6 = inlined_call_operand.vmem [shape: f32[1,128], index: 6, kind: input, shape index: {}]   ;;  %s2140_s7 = inlined_call_operand.hbm [shape: bf16[128,128], index: 7, kind: input, shape index: {}]   ;;  %s2141_s8 = inlined_call_operand.hbm [shape: bf16[128,128], index: 8, kind: output, shape index: {}]  }
   0x1   :  { %2147 = sst [smem:[#allocation13_spill]] %s2140_s7 }
   0x2   :  { %13 = vsyncpa [#allocation4], 0 }
   0x3   :  { %15 = vsyncpa [#allocation4 + $0x1], 0 }
   0x4   :  { %16 = vsyncpa [#allocation7], 0 }
   0x5   :  { %17 = vsyncpa [#allocation5], 0 }
   0x6   :  { %19 = vsyncpa [#allocation5 + $0x1], 0  ;;  %s1748_s27 = smov 0   ;;  %s1750_s28 = smov 0  }
   0x7   :  { %s1752_s29 = smov 0   ;;  %s1754_s30 = smov 0  }
   0x8   :  { %s1756_s9 = smov 0   ;;  %s1758_s10 = smov 0  }
   0x9 LB: > { %s1211_s11 = sadd.s32 4294967295, %s1690_s10   ;;  %s1212_s12 = sadd.s32 4294967294, %s1690_s10   ;;  %s1690_s10 = sphi %s1758_s10, %s25_s10   ;;  %s1686_s9 = sphi %s1756_s9, %s2170_s9   ;;  %s1682_s30 = sphi %s1754_s30, %s2169_s30   ;;  %s1678_s29 = sphi %s1752_s29, %s2168_s29   ;;  %s1674_s28 = sphi %s1750_s28, %s2167_s28   ;;  %s1670_s27 = sphi %s1748_s27, %s2166_s27  }
   0xa   : > { %p59_p0 = scmp.ne.s32.totalorder %s1674_s28, %s1670_s27  ;;  %p1782_p1 = scmp.eq.s32.totalorder %s1211_s11, 0 }
   0xb   : > { %p1786_p2 = scmp.eq.s32.totalorder %s1211_s11, 1  ;;  %p241_p3 = scmp.eq.s32.totalorder %s1212_s12, 1 }
   0xc   : > { %s2148_s13 = scalar_select %p1782_p1, 1, 0 }
   0xd   : > { %s2149_s14 = scalar_select %p1786_p2, 1, 0 }
   0xe   : > { %p1792_p4 = por %p1782_p1, %p59_p0  ;;  %p1213_p5 = scmp.ge.s32.totalorder %s1690_s10, 1 }
   0xf   : > { %p1797_p6 = por %p241_p3, %p59_p0  ;;  %p248_p7 = scmp.lt.s32.totalorder %s1690_s10, 3 }
  0x10   : > { %s2150_s15 = scalar_select %p1792_p4, 1, 0 }
  0x11   : > { %s2151_s16 = scalar_select %p1797_p6, 1, 0 }
  0x12   : > { %p1802_p8 = pnand %p1213_p5, %p248_p7  ;;  %s1692_s18 = smov [#allocation6]  }
  0x13   : > { %2152 = sst [smem:[#allocation12_spill]] %s2151_s16  ;;  %s275_s19 = sshll.u32 %s1692_s18, 4  ;;  %s276_s19 = int_to_ptr.vmem [resolvable:$true] %s275_s19 }
  0x14   : > { %s2153_s17 = scalar_select %p1802_p8, 1, 0 }
  0x15   : > { %p1431_p9 = pneg %p1802_p8  ;;  %s37_s21 = sadd.s32 1, %s1686_s9 }
  0x16   : > { %s2155_s7 = sld [smem:[#allocation13_spill]] }
  0x17   : > { %p1811_p11 = pnand %p1431_p9, %p1782_p1 }
  0x19   : > { %p1548_p13 = pneg %p1811_p11 }
  0x1c   : > { %s1546_s24 = scalar_lea.hbm %s2155_s7, 1024 }
  0x1d   : > { %p1547_p12 = scmp.ne.s32.totalorder %s2155_s7, %s1546_s24  ;;  %p1553_p5 = scmp.lt.u32.totalorder %s1546_s24, %s2155_s7 }
  0x1f   : > { %p1549_p0 = pnand %p1548_p13, %p1547_p12 }
  0x21   : > { %p1550_p3 = pneg %p1549_p0 }
  0x23   : > { %p1555_p7 = pnand %p1553_p5, %p1550_p3 }
  0x25   : > { %1558 = shalt.err (!%p1555_p7)
}
  0x26   : > { %s1559_s18 = scalar_lea.vmem %s276_s19, 1024  ;;  %p1567_p1 = scmp.lt.s32.totalorder %s276_s19, %s276_s19 }
  0x27   : > { %p1560_p9 = scmp.ne.s32.totalorder %s276_s19, %s1559_s18  ;;  %p1568_p4 = scmp.lt.s32.totalorder %s1559_s18, %s1559_s18 }
  0x29   : > { %p1562_p10 = pnand %p1560_p9, %p1548_p13  ;;  %p1569_p8 = por %p1568_p4, %p1567_p1 }
  0x2b   : > { %p1563_p6 = pneg %p1562_p10 }
  0x2d   : > { %p1570_p2 = pnand %p1569_p8, %p1563_p6 }
  0x2f   : > { %1573 = shalt.err (!%p1570_p2)
}
  0x30   : > { %s1693_s22 = smov 64   ;;  %s1694_s23 = smov 4  }
  0x31   : > { %1434 = dma.hbm_to_vmem [thread:$0]  (!%p1811_p11), %s2155_s7, 1024, %s276_s19, [#allocation7], %s1693_s22, %s1693_s22, %s1694_s23  }
  0x32   : > { %p39_p1 = scmp.ge.s32.totalorder %s37_s21, 2  ;;  %s46_s26 = sadd.s32 1, %s1678_s29 }
  0x33   : > { %p53_p2 = scmp.ne.s32.totalorder %s1678_s29, %s1674_s28  ;;  %p54_p4 = scmp.eq.s32.totalorder %s1690_s10, 0 }
  0x34   : > { %s2172_s21 = smov (%p39_p1, %s37_s21), 0  ;;  %p2157_p8 = scmp.ne.s32.totalorder %s2149_s14, 0 }
  0x35   : > { %p1838_p6 = por %p54_p4, %p53_p2  ;;  %s41_s20 = ssub.s32 %s1686_s9, %s2172_s21 }
  0x36   : > { %p1844_p10 = por %p2157_p8, %p53_p2  ;;  %p1444_p12 = scmp.lt.s32.totalorder %s1690_s10, 2 }
  0x37   : > { %p44_p11 = scmp.eq.s32.totalorder %s41_s20, 0  ;;  %s289_s19 = sand.u32 1, %s1678_s29  }
  0x38   : > { %s1216_s18 = sshll.u32 %s289_s19, 4  ;;  %s1266_s23 = sshll.u32 %s1686_s9, 8 }
  0x39   : > { %s1853_s22 = scalar_select %p44_p11, %s1678_s29, %s46_s26  }
  0x3a   : > { %s1859_s7 = scalar_lea.hbm %s2133_s0, %s1266_s23  ;;  %s293_s14 = scalar_lea.vmem [#allocation3], %s1216_s18 }
  0x3b   : > { %s301_s16 = sshll.u32 %s293_s14, 4  ;;  %p1865_p13 = pnand %p1444_p12, %p1838_p6  ;;  %s1861_s16 = int_to_ptr.vmem [resolvable:$true] %s301_s16 }
  0x3c   : > { %s1869_s26 = scalar_lea.sflag [#allocation4], %s289_s19  ;;  %s1574_s24 = scalar_lea.hbm %s1859_s7, 256 }
  0x3d   : > { %p1575_p0 = scmp.ne.s32.totalorder %s1859_s7, %s1574_s24  ;;  %p1576_p3 = pneg %p1865_p13 }
  0x3e   : > { %s1579_s11 = scalar_lea.hbm %s2133_s0, 512  ;;  %p1580_p9 = scmp.lt.u32.totalorder %s1859_s7, %s2133_s0 }
  0x3f   : > { %p1577_p5 = pnand %p1576_p3, %p1575_p0  ;;  %p1581_p1 = scmp.lt.u32.totalorder %s1579_s11, %s1574_s24 }
  0x40   : > { %p1583_p4 = scmp.lt.u32.totalorder %s1574_s24, %s1859_s7 }
  0x41   : > { %p1578_p7 = pneg %p1577_p5  ;;  %p1582_p2 = por %p1581_p1, %p1580_p9 }
  0x43   : > { %p1584_p6 = por %p1583_p4, %p1582_p2 }
  0x45   : > { %p1585_p8 = pnand %p1584_p6, %p1578_p7 }
  0x47   : > { %1588 = shalt.err (!%p1585_p8)
}
  0x48   : > { %s1589_s19 = scalar_lea.vmem %s1861_s16, 256  ;;  %s1695_s18 = smov [#allocation3]  }
  0x49   : > { %p1590_p12 = scmp.ne.s32.totalorder %s1861_s16, %s1589_s19  ;;  %s1594_s23 = sshll.u32 %s1695_s18, 4  ;;  %s1595_s23 = int_to_ptr.vmem [resolvable:$false] %s1594_s23 }
  0x4a   : > { %s1596_s25 = scalar_lea.vmem %s1595_s23, 512  ;;  %p1597_p5 = scmp.lt.s32.totalorder %s1861_s16, %s1595_s23 }
  0x4b   : > { %p1592_p11 = pnand %p1590_p12, %p1576_p3  ;;  %p1598_p9 = scmp.lt.s32.totalorder %s1596_s25, %s1589_s19 }
  0x4d   : > { %p1593_p0 = pneg %p1592_p11  ;;  %p1599_p1 = por %p1598_p9, %p1597_p5 }
  0x4f   : > { %p1600_p2 = pnand %p1599_p1, %p1593_p0 }
  0x51   : > { %1603 = shalt.err (!%p1600_p2)
}
  0x52   : > { %s1696_s24 = smov 128   ;;  %s1697_s11 = smov 8  }
  0x53   : > { %1438 = dma.hbm_to_vmem [thread:$0]  (!%p1865_p13), %s1859_s7, 256, %s1861_s16, %s1869_s26, %s1696_s24, %s1696_s24, %s1697_s11  }
  0x54   : > { %p2160_p3 = scmp.ne.s32.totalorder %s2153_s17, 0 }
  0x55   : > { %s1900_s14 = sand.u32 (!%p2160_p3), 1, %s1674_s28   ;;  %p2161_p7 = scmp.ne.s32.totalorder (!%p2160_p3), %s2150_s15, 0 }
  0x56   : > { %322 = sbr.rel (%p2160_p3) target bundleno = 1135 (0x46f), region = 52  ;;  %s1220_s19 = sshll.u32 (!%p2160_p3), %s1900_s14, 4 }
  0x57   : > { %s325_s18 = scalar_lea.sflag (!%p2160_p3), [#allocation4], %s1900_s14  ;;  %s1904_s23 = scalar_lea.vmem (!%p2160_p3), [#allocation3], %s1220_s19 }
  0x5d   : > { %1657 = dma.done.wait (%p2161_p7), %s325_s18, 256  }
  0x5e   : > { %1659 = vsyncadd (%p2161_p7), %s325_s18, 4294967040  ;;  %p2162_p13 = scmp.ne.s32.totalorder %s2148_s13, 0 }
  0x60   : > { %1661 = dma.done.wait (%p2162_p13), [#allocation7], 1024  }
  0x61   : > { %1663 = vsyncadd (%p2162_p13), [#allocation7], 4294966272  ;;  %s1223_s7 = sshll.u32 %s1682_s30, 3  ;;  %v1698_v0 = vmov 0   ;;  %v1506_v1 = vld [vmem:[%s2134_s1] sm:$0xff]   ;;  %v1507_v2 = vld [vmem:[%s2134_s1 + $0x8] sm:$0xff]   ;;  %v762_v59 = vlaneseq }
  0x62   : > { %1504 = vset.pattern.permute.xlu0 %v1698_v0  ;;  %1505 = vset.pattern.permute.xlu1 %v1698_v0  ;;  %p372_p4 = scmp.lt.s32.totalorder %s1223_s7, 15  ;;  %v1508_v3 = vld [vmem:[%s2134_s1 + $0x10] sm:$0xff]   ;;  %v1509_v4 = vld [vmem:[%s2134_s1 + $0x18] sm:$0xff]   ;;  %v1510_v9 = vld [vmem:[%s2134_s1 + $0x20] sm:$0xff]   ;;  %v1699_v63 = vmov 0.0   ;;  %s1222_s13 = sshll.u32 %s1900_s14, 5 }
  0x63   : > { %1335 = vmatprep.subr.bf16.mxu0 %v1506_v1  ;;  %v391_v5 = vld [vmem:[%s1904_s23] sm:$0xff]  ;;  %v1515_v13 = vld [vmem:[%s2136_s3 + $0x8] sm:$0xff]   ;;  %v1517_v21 = vld [vmem:[%s2136_s3 + $0x18] sm:$0xff]   ;;  %v763_v60 = vand.u32 127, %v762_v59  ;;  %s369_s25 = scalar_lea.vmem [#allocation8], %s1222_s13  ;;  %s1275_s11 = sshll.u32 %s1682_s30, 9 }
  0x64   : > { %s2174_s7 = smov (!%p372_p4, %s1223_s7), 15  ;;  %1336 = vmatpush3.bf16.msra.mxu0 %v1506_v1  ;;  %v393_v7 = vunpack.c.l.s8.bf16 %v391_v5  ;;  %v1514_v12 = vld [vmem:[%s2136_s3] sm:$0xff]   ;;  %v1511_v14 = vld [vmem:[%s2134_s1 + $0x28] sm:$0xff]   ;;  %v1516_v18 = vld [vmem:[%s2136_s3 + $0x10] sm:$0xff]   ;;  %v394_v26 = vunpack.c.h.s8.bf16 %v391_v5  ;;  %s1104_s24 = sshll.u32 %s369_s25, 4  ;;  %s2077_s24 = int_to_ptr.vmem [resolvable:$true] %s1104_s24 }
  0x65   : > { %s1224_s26 = sshll.u32 %s2174_s7, 3  ;;  %1337 = vmatprep.subr.bf16.mxu0 %v1507_v2  ;;  %1359 = vmatprep.subr.bf16.mxu1 %v1514_v12  ;;  %v1512_v20 = vld [vmem:[%s2134_s1 + $0x30] sm:$0xff]   ;;  %v1513_v22 = vld [vmem:[%s2134_s1 + $0x38] sm:$0xff]   ;;  %v1518_v23 = vld [vmem:[%s2136_s3 + $0x20] sm:$0xff]   ;;  %vm764_vm0 = vcmp.lt.s32.totalorder %v763_v60, 32  ;;  %s2084_s16 = scalar_lea.hbm %s2141_s8, %s1275_s11 }
  0x66   : > { %s1927_s19 = scalar_lea.vmem %s2135_s2, %s1224_s26  ;;  %1351 = vmatprep.mubr.bf16.mxu0 %v393_v7  ;;  %1360 = vmatpush3.bf16.msra.mxu1 %v1514_v12  ;;  %v392_v24 = vld [vmem:[%s1904_s23 + $0x8] sm:$0xff]  ;;  %v1520_v29 = vld [vmem:[%s2136_s3 + $0x30] sm:$0xff]   ;;  %v1233_v61 = vld [vmem:[%s2137_s4] ss:$0 sm:$0xff]  ;;  %v2005_v0 = vsel %vm764_vm0, 1.0, %v1699_v63  ;;  %s1091_s30 = scalar_lea.sflag [#allocation5], %s1900_s14 }
  0x67   : > { %v566_v6 = vld [vmem:[%s1927_s19] sm:$0xff]  ;;  %v568_v8 = vld [vmem:[%s1927_s19 + $0x10] sm:$0xff]  ;;  %v567_v10 = vld [vmem:[%s1927_s19 + $0x8] sm:$0xff]  ;;  %1361 = vmatprep.subr.bf16.mxu1 %v1515_v13  ;;  %v395_v27 = vunpack.c.l.s8.bf16 %v392_v24  ;;  %v396_v28 = vunpack.c.h.s8.bf16 %v392_v24  ;;  %s1604_s7 = scalar_lea.vmem %s2077_s24, 512  ;;  %s1700_s17 = smov [#allocation8]  }
  0x68   : > { %1338 = vmatpush3.bf16.msra.mxu0 %v1507_v2  ;;  %576 = vperm.xlu0 %1504, %v566_v6   ;;  %v569_v11 = vld [vmem:[%s1927_s19 + $0x18] sm:$0xff]  ;;  %v570_v15 = vld [vmem:[%s1927_s19 + $0x20] sm:$0xff]  ;;  %v571_v16 = vld [vmem:[%s1927_s19 + $0x28] sm:$0xff]  ;;  %p1605_p6 = scmp.ne.s32.totalorder %s2077_s24, %s1604_s7  ;;  %s1608_s15 = sshll.u32 %s1700_s17, 4  ;;  %s1609_s15 = int_to_ptr.vmem [resolvable:$false] %s1608_s15 }
  0x69   : > { %1339 = vmatprep.subr.bf16.mxu0 %v1508_v3  ;;  %586 = vperm.xlu1 %1505, %v568_v8   ;;  %v572_v17 = vld [vmem:[%s1927_s19 + $0x30] sm:$0xff]  ;;  %v573_v19 = vld [vmem:[%s1927_s19 + $0x38] sm:$0xff]  ;;  %v1519_v25 = vld [vmem:[%s2136_s3 + $0x28] sm:$0xff]   ;;  %s1610_s19 = scalar_lea.vmem %s1609_s15, 1024  ;;  %p1611_p11 = scmp.lt.s32.totalorder %s2077_s24, %s1609_s15 }
  0x6a   : > { %1362 = vmatpush3.bf16.msra.mxu1 %v1515_v13  ;;  %v1521_v30 = vld [vmem:[%s2136_s3 + $0x38] sm:$0xff]   ;;  %p1606_p8 = pnand %p1605_p6, %p1844_p10  ;;  %p1612_p0 = scmp.lt.s32.totalorder %s1610_s19, %s1604_s7 }
  0x6b   : > { %1363 = vmatprep.subr.bf16.mxu1 %v1516_v18 }
  0x6c   : > { %1340 = vmatpush3.bf16.msra.mxu0 %v1508_v3  ;;  %581 = vperm.xlu0 %1504, %v567_v10   ;;  %p1607_p12 = pneg %p1606_p8  ;;  %p1613_p5 = por %p1612_p0, %p1611_p11 }
  0x6d   : > { %1341 = vmatprep.subr.bf16.mxu0 %v1509_v4  ;;  %591 = vperm.xlu1 %1505, %v569_v11  }
  0x6e   : > { %1364 = vmatpush3.bf16.msra.mxu1 %v1516_v18  ;;  %p1614_p9 = pnand %p1613_p5, %p1607_p12 }
  0x6f   : > { %1365 = vmatprep.subr.bf16.mxu1 %v1517_v21 }
  0x70   : > { %1342 = vmatpush3.bf16.msra.mxu0 %v1509_v4  ;;  %596 = vperm.xlu0 %1504, %v570_v15  }
  0x71   : > { %1343 = vmatprep.subr.bf16.mxu0 %v1510_v9  ;;  %601 = vperm.xlu1 %1505, %v571_v16  }
  0x72   : > { %1366 = vmatpush3.bf16.msra.mxu1 %v1517_v21 }
  0x73   : > { %1367 = vmatprep.subr.bf16.mxu1 %v1518_v23 }
  0x74   : > { %1344 = vmatpush3.bf16.msra.mxu0 %v1510_v9  ;;  %606 = vperm.xlu0 %1504, %v572_v17  }
  0x75   : > { %1345 = vmatprep.subr.bf16.mxu0 %v1511_v14  ;;  %611 = vperm.xlu1 %1505, %v573_v19  }
  0x76   : > { %1368 = vmatpush3.bf16.msra.mxu1 %v1518_v23 }
  0x77   : > { %1369 = vmatprep.subr.bf16.mxu1 %v1519_v25 }
  0x78   : > { %1346 = vmatpush3.bf16.msra.mxu0 %v1511_v14 }
  0x79   : > { %1347 = vmatprep.subr.bf16.mxu0 %v1512_v20 }
  0x7a   : > { %1370 = vmatpush3.bf16.msra.mxu1 %v1519_v25 }
  0x7b   : > { %1371 = vmatprep.subr.bf16.mxu1 %v1520_v29 }
  0x7c   : > { %1348 = vmatpush3.bf16.msra.mxu0 %v1512_v20 }
  0x7d   : > { %1349 = vmatprep.subr.bf16.mxu0 %v1513_v22 }
  0x7e   : > { %1372 = vmatpush3.bf16.msra.mxu1 %v1520_v29 }
  0x7f   : > { %1373 = vmatprep.subr.bf16.mxu1 %v1521_v30 }
  0x80   : > { %1350 = vmatpush3.bf16.msra.mxu0 %v1513_v22 }
  0x82   : > { %1374 = vmatpush3.bf16.msra.mxu1 %v1521_v30 }
  0x83   : > { %1352 = vmatmul.mubr.bf16.vlgmr.msra.gmra.mrb[0].mxu0 %v394_v26 }
  0x84   : > { %1355 = vmatprep.mubr.bf16.mxu0 %v395_v27 }
  0x8b   : > { %1356 = vmatmul.mubr.bf16.gmra.mrb[4].mxu0 %v396_v28 }
  0xe7   : > { %v1978_v31 = vpop.permute.xlu0 %576 }
  0xe8   : > { %v1980_v32 = vpop.permute.xlu1 %586 }
  0xeb   : > { %v1982_v33 = vpop.permute.xlu0 %581 }
  0xec   : > { %v1984_v34 = vpop.permute.xlu1 %591 }
  0xef   : > { %v1986_v38 = vpop.permute.xlu0 %596 }
  0xf0   : > { %v1990_v42 = vpop.permute.xlu1 %601 }
  0xf3   : > { %v1994_v48 = vpop.permute.xlu0 %606 }
  0xf4   : > { %v1996_v50 = vpop.permute.xlu1 %611 }
 0x156   : > { %v1353_v35 = vpop.f32.mrb[0].mxu0 }
 0x157   : > { %v508_v36 = vpop.f32.mrb[1].mxu0  ;;  %v616_v39 = vmul.f32 %v1353_v35, %v1980_v32 }
 0x158   : > { %v1354_v37 = vpop.f32.mrb[2].mxu0  ;;  %v614_v43 = vmul.f32 %v1978_v31, %v508_v36 }
 0x159   : > { %v617_v40 = vmul.f32 %v1354_v37, %v1984_v34  ;;  %v511_v41 = vpop.f32.mrb[3].mxu0 }
 0x15a   : > { %v615_v44 = vmul.f32 %v1982_v33, %v511_v41 }
 0x15b   : > { %v623_v45 = vpack.c.bf16 %v617_v40, %v616_v39 }
 0x15c   : > { %v622_v46 = vpack.c.bf16 %v615_v44, %v614_v43 }
 0x15e   : > { %v1357_v47 = vpop.f32.mrb[4].mxu0  ;;  %1375 = vmatprep.mubr.bf16.mxu1 %v622_v46 }
 0x15f   : > { %v524_v49 = vpop.f32.mrb[5].mxu0  ;;  %1376 = vmatmul.mubr.bf16.vlgmr.msra.gmra.mrb[0].mxu1 %v623_v45  ;;  %v620_v52 = vmul.f32 %v1357_v47, %v1994_v48 }
 0x160   : > { %v1358_v51 = vpop.f32.mrb[6].mxu0  ;;  %v618_v55 = vmul.f32 %v1986_v38, %v524_v49 }
 0x161   : > { %v621_v53 = vmul.f32 %v1358_v51, %v1996_v50  ;;  %v527_v54 = vpop.f32.mrb[7].mxu0 }
 0x162   : > { %v619_v56 = vmul.f32 %v1990_v42, %v527_v54 }
 0x163   : > { %v625_v57 = vpack.c.bf16 %v621_v53, %v620_v52 }
 0x164   : > { %v624_v58 = vpack.c.bf16 %v619_v56, %v618_v55 }
 0x166   : > { %1379 = vmatprep.mubr.bf16.mxu1 %v624_v58 }
 0x167   : > { %1380 = vmatmul.mubr.bf16.gmra.mrb[4].mxu1 %v625_v57 }
 0x232   : > { %v1377_v62 = vpop.f32.mrb[0].mxu1 }
 0x233   : > { %v740_v1 = vadd.f32 %v1377_v62, %v1233_v61  ;;  %v731_v2 = vpop.f32.mrb[1].mxu1 }
 0x234   : > { %v732_v3 = vadd.f32 %v1233_v61, %v731_v2  ;;  %v1378_v4 = vpop.f32.mrb[2].mxu1 }
 0x235   : > { %v734_v5 = vpop.f32.mrb[3].mxu1  ;;  %v769_v6 = vmul.f32 %v2005_v0, %v740_v1  ;;  %v743_v7 = vadd.f32 %v1378_v4, %v1233_v61 }
 0x236   : > { %v735_v8 = vadd.f32 %v1233_v61, %v734_v5  ;;  %v767_v9 = vmul.f32 %v2005_v0, %v732_v3 }
 0x237   : > { %779 = vadd.xlane.f32.xlu1 %v769_v6  ;;  %v770_v12 = vmul.f32 %v2005_v0, %v743_v7 }
 0x238   : > { %775 = vadd.xlane.f32.xlu0 %v767_v9  ;;  %v768_v10 = vmul.f32 %v2005_v0, %v735_v8  ;;  %v1522_v9 = vld [vmem:[#allocation6] sm:$0xff]  }
 0x239   : > { %1383 = vmatprep.subr.bf16.mxu0 %v1522_v9  ;;  %1407 = vmatprep.subr.bf16.mxu1 %v1522_v9 }
 0x23a   : > { %v1381_v11 = vpop.f32.mrb[4].mxu1  ;;  %1384 = vmatpush3.bf16.msra.mxu0 %v1522_v9  ;;  %1415 = vmatpush3.bf16.msra.mxu1 %v1522_v9 }
 0x23b   : > { %v756_v13 = vadd.f32 %v1381_v11, %v1233_v61  ;;  %777 = vadd.xlane.f32.xlu1 %v768_v10  ;;  %v747_v14 = vpop.f32.mrb[5].mxu1  ;;  %v1523_v10 = vld [vmem:[#allocation6 + $0x8] sm:$0xff]   ;;  %v1524_v11 = vld [vmem:[#allocation6 + $0x10] sm:$0xff]  }
 0x23c   : > { %v748_v15 = vadd.f32 %v1233_v61, %v747_v14  ;;  %781 = vadd.xlane.f32.xlu0 %v770_v12  ;;  %v1382_v16 = vpop.f32.mrb[6].mxu1  ;;  %1385 = vmatprep.subr.bf16.mxu0 %v1523_v10  ;;  %v1526_v12 = vld [vmem:[#allocation6 + $0x20] sm:$0xff]   ;;  %v1528_v14 = vld [vmem:[#allocation6 + $0x30] sm:$0xff]  }
 0x23d   : > { %v750_v17 = vpop.f32.mrb[7].mxu1  ;;  %v773_v18 = vmul.f32 %v2005_v0, %v756_v13  ;;  %v759_v21 = vadd.f32 %v1382_v16, %v1233_v61  ;;  %1408 = vmatprep.subr.bf16.mxu1 %v1523_v10 }
 0x23e   : > { %v751_v19 = vadd.f32 %v1233_v61, %v750_v17  ;;  %v771_v20 = vmul.f32 %v2005_v0, %v748_v15  ;;  %1386 = vmatpush3.bf16.msra.mxu0 %v1523_v10  ;;  %1416 = vmatpush3.bf16.msra.mxu1 %v1523_v10 }
 0x23f   : > { %787 = vadd.xlane.f32.xlu1 %v773_v18  ;;  %v774_v23 = vmul.f32 %v2005_v0, %v759_v21  ;;  %1387 = vmatprep.subr.bf16.mxu0 %v1524_v11 }
 0x240   : > { %783 = vadd.xlane.f32.xlu0 %v771_v20  ;;  %v772_v22 = vmul.f32 %v2005_v0, %v751_v19  ;;  %1409 = vmatprep.subr.bf16.mxu1 %v1524_v11 }
 0x242   : > { %1388 = vmatpush3.bf16.msra.mxu0 %v1524_v11  ;;  %1417 = vmatpush3.bf16.msra.mxu1 %v1524_v11 }
 0x244   : > { %785 = vadd.xlane.f32.xlu0 %v772_v22 }
 0x248   : > { %789 = vadd.xlane.f32.xlu0 %v774_v23 }
 0x2c4   : > { %v780_v24 = vpop.xlane.xlu1 %779 }
 0x2c5   : > { %v793_v25 = vmul.f32 0.03125, %v780_v24  ;;  %v776_v26 = vpop.xlane.xlu0 %775 }
 0x2c6   : > { %v791_v27 = vmul.f32 0.03125, %v776_v26 }
 0x2c7   : > { %v801_v28 = vsub.f32 %v740_v1, %v793_v25 }
 0x2c8   : > { %v799_v29 = vsub.f32 %v732_v3, %v791_v27  ;;  %v778_v30 = vpop.xlane.xlu1 %777 }
 0x2c9   : > { %v792_v35 = vmul.f32 0.03125, %v778_v30  ;;  %v782_v36 = vpop.xlane.xlu0 %781  ;;  %v2016_v37 = vmul.f32 %v2005_v0, %v801_v28 }
 0x2ca   : > { %v794_v39 = vmul.f32 0.03125, %v782_v36  ;;  %v2021_v41 = vmul.f32 %v2005_v0, %v799_v29 }
 0x2cb   : > { %v817_v40 = vmul.f32 %v2016_v37, %v2016_v37  ;;  %v800_v43 = vsub.f32 %v735_v8, %v792_v35 }
 0x2cc   : > { %v802_v44 = vsub.f32 %v743_v7, %v794_v39  ;;  %v788_v45 = vpop.xlane.xlu1 %787  ;;  %v815_v52 = vmul.f32 %v2021_v41, %v2021_v41 }
 0x2cd   : > { %v797_v46 = vmul.f32 0.03125, %v788_v45  ;;  %827 = vadd.xlane.f32.xlu1 %v817_v40  ;;  %v784_v47 = vpop.xlane.xlu0 %783  ;;  %v2031_v56 = vmul.f32 %v2005_v0, %v800_v43 }
 0x2ce   : > { %v795_v49 = vmul.f32 0.03125, %v784_v47  ;;  %v2024_v51 = vmul.f32 %v2005_v0, %v802_v44 }
 0x2cf   : > { %v805_v53 = vsub.f32 %v756_v13, %v797_v46  ;;  %v816_v61 = vmul.f32 %v2031_v56, %v2031_v56  ;;  %v1527_v13 = vld [vmem:[#allocation6 + $0x28] sm:$0xff]  }
 0x2d0   : > { %v803_v54 = vsub.f32 %v748_v15, %v795_v49  ;;  %v818_v55 = vmul.f32 %v2024_v51, %v2024_v51  ;;  %v1529_v15 = vld [vmem:[#allocation6 + $0x38] sm:$0xff]  }
 0x2d1   : > { %823 = vadd.xlane.f32.xlu1 %v815_v52  ;;  %v786_v57 = vpop.xlane.xlu0 %785  ;;  %v2041_v63 = vmul.f32 %v2005_v0, %v805_v53 }
 0x2d2   : > { %v796_v58 = vmul.f32 0.03125, %v786_v57  ;;  %829 = vadd.xlane.f32.xlu0 %v818_v55  ;;  %v2034_v59 = vmul.f32 %v2005_v0, %v803_v54 }
 0x2d3   : > { %v821_v5 = vmul.f32 %v2041_v63, %v2041_v63 }
 0x2d4   : > { %v804_v60 = vsub.f32 %v751_v19, %v796_v58  ;;  %v819_v62 = vmul.f32 %v2034_v59, %v2034_v59  ;;  %v1243_v58 = vld [vmem:[%s2138_s5] ss:$0 sm:$0xff] }
 0x2d5   : > { %v790_v1 = vpop.xlane.xlu0 %789 }
 0x2d6   : > { %v798_v2 = vmul.f32 0.03125, %v790_v1  ;;  %825 = vadd.xlane.f32.xlu0 %v816_v61  ;;  %831 = vadd.xlane.f32.xlu1 %v819_v62  ;;  %v2044_v3 = vmul.f32 %v2005_v0, %v804_v60 }
 0x2d8   : > { %v806_v4 = vsub.f32 %v759_v21, %v798_v2  ;;  %v820_v6 = vmul.f32 %v2044_v3, %v2044_v3 }
 0x2da   : > { %835 = vadd.xlane.f32.xlu1 %v821_v5  ;;  %833 = vadd.xlane.f32.xlu0 %v820_v6  ;;  %v2051_v7 = vmul.f32 %v2005_v0, %v806_v4  ;;  %v1525_v0 = vld [vmem:[#allocation6 + $0x18] sm:$0xff]  }
 0x2db   : > { %1389 = vmatprep.subr.bf16.mxu0 %v1525_v0  ;;  %1410 = vmatprep.subr.bf16.mxu1 %v1525_v0 }
 0x2dc   : > { %v822_v8 = vmul.f32 %v2051_v7, %v2051_v7  ;;  %1390 = vmatpush3.bf16.msra.mxu0 %v1525_v0  ;;  %1418 = vmatpush3.bf16.msra.mxu1 %v1525_v0 }
 0x2dd   : > { %1391 = vmatprep.subr.bf16.mxu0 %v1526_v12  ;;  %1411 = vmatprep.subr.bf16.mxu1 %v1526_v12 }
 0x2de   : > { %837 = vadd.xlane.f32.xlu0 %v822_v8 }
 0x2e0   : > { %1392 = vmatpush3.bf16.msra.mxu0 %v1526_v12  ;;  %1419 = vmatpush3.bf16.msra.mxu1 %v1526_v12 }
 0x2e1   : > { %1393 = vmatprep.subr.bf16.mxu0 %v1527_v13  ;;  %1412 = vmatprep.subr.bf16.mxu1 %v1527_v13 }
 0x2e4   : > { %1394 = vmatpush3.bf16.msra.mxu0 %v1527_v13  ;;  %1420 = vmatpush3.bf16.msra.mxu1 %v1527_v13 }
 0x2e5   : > { %1395 = vmatprep.subr.bf16.mxu0 %v1528_v14  ;;  %1413 = vmatprep.subr.bf16.mxu1 %v1528_v14 }
 0x2e8   : > { %1396 = vmatpush3.bf16.msra.mxu0 %v1528_v14  ;;  %1421 = vmatpush3.bf16.msra.mxu1 %v1528_v14 }
 0x2e9   : > { %1397 = vmatprep.subr.bf16.mxu0 %v1529_v15  ;;  %1414 = vmatprep.subr.bf16.mxu1 %v1529_v15 }
 0x2ec   : > { %1398 = vmatpush3.bf16.msra.mxu0 %v1529_v15  ;;  %1422 = vmatpush3.bf16.msra.mxu1 %v1529_v15 }
 0x35a   : > { %v828_v16 = vpop.xlane.xlu1 %827 }
 0x35b   : > { %v841_v17 = vmul.f32 0.03125, %v828_v16 }
 0x35d   : > { %v849_v18 = vadd.f32 1e-05, %v841_v17 }
 0x35e   : > { %v824_v19 = vpop.xlane.xlu1 %823 }
 0x35f   : > { %v839_v20 = vmul.f32 0.03125, %v824_v19  ;;  %v830_v21 = vpop.xlane.xlu0 %829  ;;  %1530 = vrsqrt.f32 %v849_v18 }
 0x360   : > { %v842_v22 = vmul.f32 0.03125, %v830_v21 }
 0x361   : > { %v847_v23 = vadd.f32 1e-05, %v839_v20 }
 0x362   : > { %v850_v24 = vadd.f32 1e-05, %v842_v22 }
 0x363   : > { %1532 = vrsqrt.f32 %v847_v23  ;;  %v832_v25 = vpop.xlane.xlu1 %831  ;;  %v826_v26 = vpop.xlane.xlu0 %825 }
 0x364   : > { %1534 = vrsqrt.f32 %v850_v24  ;;  %v843_v27 = vmul.f32 0.03125, %v832_v25  ;;  %v840_v28 = vmul.f32 0.03125, %v826_v26 }
 0x366   : > { %v851_v29 = vadd.f32 1e-05, %v843_v27  ;;  %v848_v30 = vadd.f32 1e-05, %v840_v28 }
 0x367   : > { %v836_v35 = vpop.xlane.xlu1 %835  ;;  %v834_v36 = vpop.xlane.xlu0 %833 }
 0x368   : > { %1536 = vrsqrt.f32 %v851_v29  ;;  %v845_v39 = vmul.f32 0.03125, %v836_v35  ;;  %v844_v40 = vmul.f32 0.03125, %v834_v36 }
 0x369   : > { %1538 = vrsqrt.f32 %v848_v30  ;;  %v1531_v46 = vpop.eup %1530 }
 0x36a   : > { %v853_v43 = vadd.f32 1e-05, %v845_v39  ;;  %v852_v44 = vadd.f32 1e-05, %v844_v40  ;;  %v865_v55 = vmul.f32 %v1531_v46, %v2016_v37  ;;  %v1244_v37 = vld [vmem:[%s2139_s6] ss:$0 sm:$0xff] }
 0x36b   : > { %v838_v45 = vpop.xlane.xlu0 %837 }
 0x36c   : > { %1540 = vrsqrt.f32 %v853_v43  ;;  %v846_v47 = vmul.f32 0.03125, %v838_v45  ;;  %v880_v2 = vmul.f32 %v1243_v58, %v865_v55 }
 0x36d   : > { %v1533_v49 = vpop.eup %1532  ;;  %1542 = vrsqrt.f32 %v852_v44 }
 0x36e   : > { %v1535_v52 = vpop.eup %1534  ;;  %v854_v53 = vadd.f32 1e-05, %v846_v47  ;;  %v863_v54 = vmul.f32 %v1533_v49, %v2021_v41  ;;  %v895_v0 = vadd.f32 %v1244_v37, %v880_v2 }
 0x36f   : > { %v866_v57 = vmul.f32 %v1535_v52, %v2024_v51 }
 0x370   : > { %1544 = vrsqrt.f32 %v854_v53  ;;  %v878_v62 = vmul.f32 %v1243_v58, %v863_v54  ;;  %v903_v20 = vmax.f32 %v895_v0, 0.0 }
 0x371   : > { %v881_v60 = vmul.f32 %v1243_v58, %v866_v57 }
 0x372   : > { %v1537_v61 = vpop.eup %1536  ;;  %v893_v8 = vadd.f32 %v1244_v37, %v878_v62 }
 0x373   : > { %v1539_v1 = vpop.eup %1538  ;;  %v867_v4 = vmul.f32 %v1537_v61, %v2034_v59  ;;  %v896_v41 = vadd.f32 %v1244_v37, %v881_v60 }
 0x374   : > { %v864_v5 = vmul.f32 %v1539_v1, %v2031_v56  ;;  %v901_v56 = vmax.f32 %v893_v8, 0.0 }
 0x375   : > { %v882_v9 = vmul.f32 %v1243_v58, %v867_v4  ;;  %v904_v59 = vmax.f32 %v896_v41, 0.0 }
 0x376   : > { %v1541_v51 = vpop.eup %1540  ;;  %v879_v6 = vmul.f32 %v1243_v58, %v864_v5 }
 0x377   : > { %v1543_v10 = vpop.eup %1542  ;;  %v869_v11 = vmul.f32 %v1541_v51, %v2041_v63  ;;  %v897_v18 = vadd.f32 %v1244_v37, %v882_v9  ;;  %v910_v24 = vpack.c.bf16 %v904_v59, %v903_v20 }
 0x378   : > { %v894_v12 = vadd.f32 %v1244_v37, %v879_v6  ;;  %v868_v13 = vmul.f32 %v1543_v10, %v2044_v3 }
 0x379   : > { %v884_v14 = vmul.f32 %v1243_v58, %v869_v11  ;;  %v905_v25 = vmax.f32 %v897_v18, 0.0 }
 0x37a   : > { %v1545_v15 = vpop.eup %1544  ;;  %v902_v16 = vmax.f32 %v894_v12, 0.0  ;;  %v883_v17 = vmul.f32 %v1243_v58, %v868_v13 }
 0x37b   : > { %v870_v19 = vmul.f32 %v1545_v15, %v2051_v7  ;;  %v899_v63 = vadd.f32 %v1244_v37, %v884_v14 }
 0x37c   : > { %v909_v21 = vpack.c.bf16 %v902_v16, %v901_v56  ;;  %v898_v22 = vadd.f32 %v1244_v37, %v883_v17 }
 0x37d   : > { %v885_v23 = vmul.f32 %v1243_v58, %v870_v19  ;;  %v907_v28 = vmax.f32 %v899_v63, 0.0 }
 0x37e   : > { %1399 = vmatprep.mubr.bf16.mxu0 %v909_v21  ;;  %v906_v26 = vmax.f32 %v898_v22, 0.0 }
 0x37f   : > { %1400 = vmatmul.mubr.bf16.vlgmr.msra.gmra.mrb[8].mxu0 %v910_v24  ;;  %v900_v3 = vadd.f32 %v1244_v37, %v885_v23 }
 0x380   : > { %v911_v27 = vpack.c.bf16 %v906_v26, %v905_v25 }
 0x381   : > { %v908_v29 = vmax.f32 %v900_v3, 0.0 }
 0x382   : > { %1403 = vmatprep.mubr.bf16.mxu1 %v911_v27 }
 0x383   : > { %v912_v30 = vpack.c.bf16 %v908_v29, %v907_v28 }
 0x385   : > { %1404 = vmatmul.mubr.bf16.vlgmr.msra.gmra.mrb[8].mxu1 %v912_v30 }
 0x452   : > { %v1401_v35 = vpop.f32.mrb[8].mxu0 }
 0x453   : > { %v1011_v7 = vpop.f32.mrb[9].mxu0  ;;  %v1044_v39 = vmul.f32 %v1401_v35, %v1980_v32 }
 0x454   : > { %v1402_v36 = vpop.f32.mrb[10].mxu0  ;;  %v1042_v44 = vmul.f32 %v1011_v7, %v1978_v31 }
 0x455   : > { %v1045_v40 = vmul.f32 %v1402_v36, %v1984_v34  ;;  %v1014_v43 = vpop.f32.mrb[11].mxu0 }
 0x456   : > { %v1043_v45 = vmul.f32 %v1014_v43, %v1982_v33 }
 0x457   : > { %v1284_v46 = vpack.c.bf16 %v1045_v40, %v1044_v39 }
 0x458   : > { %v1279_v47 = vpack.c.bf16 %v1043_v45, %v1042_v44  ;;  %v1405_v49 = vpop.f32.mrb[8].mxu1 }
 0x459   : > { %1296 = vst [vmem:[%s369_s25 + $0x8] sm:$0xff] %v1284_v46   ;;  %v1027_v52 = vpop.f32.mrb[9].mxu1  ;;  %v1048_v32 = vmul.f32 %v1405_v49, %v1994_v48 }
 0x45a   : > { %1280 = vst [vmem:[%s369_s25] sm:$0xff] %v1279_v47   ;;  %v1406_v53 = vpop.f32.mrb[10].mxu1  ;;  %v1046_v31 = vmul.f32 %v1027_v52, %v1986_v38 }
 0x45b   : > { %v1049_v34 = vmul.f32 %v1406_v53, %v1996_v50  ;;  %v1030_v54 = vpop.f32.mrb[11].mxu1 }
 0x45c   : > { %v1047_v33 = vmul.f32 %v1030_v54, %v1990_v42 }
 0x45d   : > { %v1294_v55 = vpack.c.bf16 %v1049_v34, %v1048_v32 }
 0x45e   : > { %v1289_v57 = vpack.c.bf16 %v1047_v33, %v1046_v31 }
 0x45f   : > { %1298 = vst [vmem:[%s369_s25 + $0x18] sm:$0xff] %v1294_v55  }
 0x460   : > { %1297 = vst [vmem:[%s369_s25 + $0x10] sm:$0xff] %v1289_v57  }
 0x461   : > { %1617 = shalt.err (!%p1614_p9)
}
 0x462   : > { %s1618_s20 = scalar_lea.hbm %s2084_s16, 512  ;;  %s1622_s25 = scalar_lea.hbm %s2141_s8, 1024 }
 0x463   : > { %p1619_p1 = scmp.ne.s32.totalorder %s2084_s16, %s1618_s20  ;;  %p1623_p7 = scmp.lt.u32.totalorder %s2084_s16, %s2141_s8 }
 0x464   : > { %p1624_p13 = scmp.lt.u32.totalorder %s1622_s25, %s1618_s20  ;;  %p1626_p6 = scmp.lt.u32.totalorder %s1618_s20, %s2084_s16 }
 0x465   : > { %p1620_p2 = pnand %p1619_p1, %p1844_p10 }
 0x466   : > { %p1625_p4 = por %p1624_p13, %p1623_p7 }
 0x467   : > { %p1621_p3 = pneg %p1620_p2 }
 0x468   : > { %p1627_p8 = por %p1626_p6, %p1625_p4 }
 0x46a   : > { %p1628_p12 = pnand %p1627_p8, %p1621_p3 }
 0x46c   : > { %1631 = shalt.err (!%p1628_p12)
}
 0x46d   : > { %s1701_s23 = smov 64   ;;  %s1702_s7 = smov 4  }
 0x46e   : > { %1429 = dma.vmem_to_hbm [thread:$0]  (%p1844_p10), %s2077_s24, 512, %s2084_s16, %s1091_s30, %s1701_s23, %s1701_s23, %s1702_s7  }
 0x46f PF: > { %s2163_s17 = sld [smem:[#allocation12_spill]]  ;;  %s1119_s15 = sand.u32 1, %s1670_s27  }
 0x470   : > { %p2165_p0 = scmp.ge.s32.totalorder %s1690_s10, 2  ;;  %s1120_s19 = scalar_lea.sflag [#allocation5], %s1119_s15 }
 0x475   : > { %p2164_p11 = scmp.ne.s32.totalorder %s2163_s17, 0 }
 0x477   : > { %p1440_p5 = pnand %p2165_p0, %p2164_p11 }
 0x479   : > { %1665 = dma.done.wait (!%p1440_p5), %s1120_s19, 512  }
 0x47a   : > { %1667 = vsyncadd (!%p1440_p5), %s1120_s19, 4294966784  ;;  %s25_s10 = sadd.s32 1, %s1690_s10   ;;  %s2166_s27 = smov %s1674_s28 }
 0x47b   : > { %p22_p9 = scmp.ge.s32.totalorder %s25_s10, 4   ;;  %s2167_s28 = smov %s1678_s29 }
 0x47c   : > { %s2168_s29 = smov %s1853_s22  ;;  %s2169_s30 = smov %s1686_s9 }
 0x47d   : > { %s2170_s9 = smov %s2172_s21  ;;  %24 = sbr.rel (!%p22_p9) target bundleno = 9 (0x9), region = 113 }
 0x484   :  { %1125 = vsyncpa [#allocation4], 1 }
 0x485   :  { %1127 = vsyncpa [#allocation4 + $0x1], 1 }
 0x486   :  { %1128 = vsyncpa [#allocation7], 1 }
 0x487   :  { %1129 = vsyncpa [#allocation5], 1 }
 0x488   :  { %1131 = vsyncpa [#allocation5 + $0x1], 1 }

</bundles_post_ra>
